<compile_context>
chip_gen: v7x
topology: tpu7x:2x2x1
jax: 0.10.0
libtpu: 0.0.40
codegen_flags: <defaults>
</compile_context>

<pallas_src>
import jax
import jax.numpy as jnp
from jax.experimental import pallas as pl
from jax.experimental.pallas import tpu as pltpu


def spatial_aware_kernel(x_ref, w1_ref, b1_ref, w2_ref, b2_ref, o_ref):
    # x_ref : (tb, C, N)   batch tile, full C and N
    # w1_ref: (N, d*H)     all heads' first-linear weights fused on the lane axis
    # b1_ref: (1, d*H)
    # w2_ref: (d*H, d*N)   block-diagonal second-linear weight
    #                      (head j block: rows [j*H,(j+1)*H), cols [j*N,(j+1)*N))
    # b2_ref: (1, d*N)
    # o_ref : (tb, d*N)    lane-dense output slab (head-major on the lane axis)
    x = x_ref[...].astype(jnp.float32)
    c = x.shape[1]
    # Channel mean computed ONCE per batch tile: one cross-sublane sum (XLU)
    # plus a single scalar scale (cheaper than a per-element divide on v5e).
    m = jnp.sum(x, axis=1) * (1.0 / c)                                    # (tb, N)
    hid = jnp.dot(m, w1_ref[...], preferred_element_type=jnp.float32)     # (tb, d*H)
    hid = hid + b1_ref[...]
    out = jnp.dot(hid, w2_ref[...], preferred_element_type=jnp.float32)   # (tb, d*N)
    out = out + b2_ref[...]
    o_ref[...] = out.astype(o_ref.dtype)


def spatial_aware(x, w1, b1, w2, b2):
    """x: (B, C, N); w1: (d, N, H); b1: (d, 1, H); w2: (d, H, N); b2: (d, 1, N).
    Returns (B, N, d) — identical to the PyTorch module's output."""
    B, C, N = x.shape
    d, _, H = w1.shape

    # ---- weight layout plumbing (wrapper side, folds away for constant weights) ----
    # First linears of all heads fused into one (N, d*H) matrix.
    w1_f = jnp.transpose(w1, (1, 0, 2)).reshape(N, d * H)
    b1_f = b1.reshape(1, d * H)
    # Second linears as one block-diagonal (d*H, d*N) matrix so the kernel emits
    # a single lane-dense (B, d*N) output.
    eye_d = jnp.eye(d, dtype=w2.dtype)
    w2_bd = jnp.einsum('dhn,de->dhen', w2, eye_d).reshape(d * H, d * N)
    b2_f = b2.reshape(1, d * N)

    # Batch tiling: whole batch per step when small; 128-row tiles when B is
    # large (MXU-friendly M dim, bounded VMEM on v7x's 64 MiB).
    tb = 128 if (B > 128 and B % 128 == 0) else B
    grid = (B // tb,)

    out_flat = pl.pallas_call(
        spatial_aware_kernel,
        out_shape=jax.ShapeDtypeStruct((B, d * N), x.dtype),
        grid_spec=pltpu.PrefetchScalarGridSpec(
            num_scalar_prefetch=0,
            grid=grid,
            in_specs=[
                pl.BlockSpec((tb, C, N), lambda i: (i, 0, 0)),
                pl.BlockSpec((N, d * H), lambda i: (0, 0)),      # loaded once
                pl.BlockSpec((1, d * H), lambda i: (0, 0)),
                pl.BlockSpec((d * H, d * N), lambda i: (0, 0)),
                pl.BlockSpec((1, d * N), lambda i: (0, 0)),
            ],
            out_specs=pl.BlockSpec((tb, d * N), lambda i: (i, 0)),
        ),
        compiler_params=pltpu.CompilerParams(
            dimension_semantics=("parallel",)),   # batch-tile axis shards across TCs (v7x)
    )(x, w1_f, b1_f, w2_bd, b2_f)

    # (B, d*N) -> (B, d, N) -> (B, N, d); layout-only, matches torch.stack(..., -1).
    return jnp.transpose(out_flat.reshape(B, d, N), (0, 2, 1))


def spatial_aware_reference(x, w1, b1, w2, b2):
    """Pure-JAX reference mirroring the PyTorch forward."""
    m = jnp.mean(x, axis=1)                                   # (B, N)
    hid = jnp.einsum('bn,dnh->dbh', m, w1) + b1               # (d, B, H)
    out = jnp.einsum('dbh,dhn->dbn', hid, w2) + b2            # (d, B, N)
    return jnp.transpose(out, (1, 2, 0))                      # (B, N, d)


if __name__ == "__main__":
    # SpatialAware(in_channel=16, d=8) at small shapes: x is (B=2, C=4, N=16)
    B, C, N, d = 2, 4, 16, 8
    H = N // 2

    key = jax.random.PRNGKey(0)
    kx, k1, k2, k3, k4 = jax.random.split(key, 5)
    x = jax.random.normal(kx, (B, C, N), dtype=jnp.float32)
    w1 = 0.1 * jax.random.normal(k1, (d, N, H), dtype=jnp.float32)
    b1 = 0.1 * jax.random.normal(k2, (d, 1, H), dtype=jnp.float32)
    w2 = 0.1 * jax.random.normal(k3, (d, H, N), dtype=jnp.float32)
    b2 = 0.1 * jax.random.normal(k4, (d, 1, N), dtype=jnp.float32)

    out = jax.jit(spatial_aware)(x, w1, b1, w2, b2)
    out = jax.block_until_ready(out)

    ref = spatial_aware_reference(x, w1, b1, w2, b2)
    assert out.shape == (B, N, d), out.shape
    assert jnp.allclose(out, ref, atol=1e-5, rtol=1e-5), "mismatch vs reference"

    print("KERNEL_OK")
</pallas_src>

<mosaic_0001>
module attributes {stable_mosaic.version = 11 : i64} {
  func.func @spatial_aware_kernel(%arg0: i32, %arg1: memref<2x4x16xf32, #tpu.memory_space<vmem>>, %arg2: memref<16x64xf32, #tpu.memory_space<vmem>>, %arg3: memref<1x64xf32, #tpu.memory_space<vmem>>, %arg4: memref<64x128xf32, #tpu.memory_space<vmem>>, %arg5: memref<1x128xf32, #tpu.memory_space<vmem>>, %arg6: memref<2x128xf32, #tpu.memory_space<vmem>>) attributes {dimension_semantics = [#tpu.dimension_semantics<parallel>], iteration_bounds = array<i64: 1>, scalar_prefetch = 0 : i64, scratch_operands = 0 : i64, tpu.core_type = #tpu.core_type<tc>, window_params = [{transform_indices = @transform_0, window_bounds = array<i64: 2, 4, 16>}, {pipeline_mode = #tpu.pipeline_mode<synchronous>, transform_indices = @transform_1, window_bounds = array<i64: 16, 64>}, {pipeline_mode = #tpu.pipeline_mode<synchronous>, transform_indices = @transform_2, window_bounds = array<i64: 1, 64>}, {pipeline_mode = #tpu.pipeline_mode<synchronous>, transform_indices = @transform_3, window_bounds = array<i64: 64, 128>}, {pipeline_mode = #tpu.pipeline_mode<synchronous>, transform_indices = @transform_4, window_bounds = array<i64: 1, 128>}, {transform_indices = @transform_5, window_bounds = array<i64: 2, 128>}]} {
    %c0 = arith.constant 0 : index
    %c0_0 = arith.constant 0 : index
    %c0_1 = arith.constant 0 : index
    %0 = vector.load %arg1[%c0, %c0_0, %c0_1] : memref<2x4x16xf32, #tpu.memory_space<vmem>>, vector<2x4x16xf32>
    %cst = arith.constant dense<0.000000e+00> : vector<2x16xf32>
    %1 = vector.multi_reduction <add>, %0, %cst [1] : vector<2x4x16xf32> to vector<2x16xf32>
    %cst_2 = arith.constant 2.500000e-01 : f32
    %2 = vector.broadcast %cst_2 : f32 to vector<2x16xf32>
    %3 = arith.mulf %1, %2 : vector<2x16xf32>
    %c0_3 = arith.constant 0 : index
    %c0_4 = arith.constant 0 : index
    %4 = vector.load %arg2[%c0_3, %c0_4] : memref<16x64xf32, #tpu.memory_space<vmem>>, vector<16x64xf32>
    %cst_5 = arith.constant dense<0.000000e+00> : vector<2x64xf32>
    %5 = tpu.matmul %3, %4, %cst_5 {dimension_numbers = #tpu.dot_dimension_numbers<[1], [0], [0], [1], [0, 0, 1, 1], [], []>} : vector<2x16xf32>, vector<16x64xf32>, vector<2x64xf32> -> vector<2x64xf32>
    %c0_6 = arith.constant 0 : index
    %c0_7 = arith.constant 0 : index
    %6 = vector.load %arg3[%c0_6, %c0_7] : memref<1x64xf32, #tpu.memory_space<vmem>>, vector<1x64xf32>
    %7 = vector.broadcast %6 : vector<1x64xf32> to vector<2x64xf32>
    %8 = arith.addf %5, %7 : vector<2x64xf32>
    %c0_8 = arith.constant 0 : index
    %c0_9 = arith.constant 0 : index
    %9 = vector.load %arg4[%c0_8, %c0_9] : memref<64x128xf32, #tpu.memory_space<vmem>>, vector<64x128xf32>
    %cst_10 = arith.constant dense<0.000000e+00> : vector<2x128xf32>
    %10 = tpu.matmul %8, %9, %cst_10 {dimension_numbers = #tpu.dot_dimension_numbers<[1], [0], [0], [1], [0, 0, 1, 1], [], []>} : vector<2x64xf32>, vector<64x128xf32>, vector<2x128xf32> -> vector<2x128xf32>
    %c0_11 = arith.constant 0 : index
    %c0_12 = arith.constant 0 : index
    %11 = vector.load %arg5[%c0_11, %c0_12] : memref<1x128xf32, #tpu.memory_space<vmem>>, vector<1x128xf32>
    %12 = vector.broadcast %11 : vector<1x128xf32> to vector<2x128xf32>
    %13 = arith.addf %10, %12 : vector<2x128xf32>
    %c0_13 = arith.constant 0 : index
    %c0_14 = arith.constant 0 : index
    %14 = vector.load %arg6[%c0_13, %c0_14] : memref<2x128xf32, #tpu.memory_space<vmem>>, vector<2x128xf32>
    tpu.vector_store %arg6[%c0_13, %c0_14], %13 {strides = array<i32>} : memref<2x128xf32, #tpu.memory_space<vmem>>, vector<2x128xf32>,
    return
  }
  func.func @transform_0(%arg0: i32) -> (i32, i32, i32) {
    %c0_i32 = arith.constant 0 : i32
    %c0_i32_0 = arith.constant 0 : i32
    %c0_i32_1 = arith.constant 0 : i32
    return %arg0, %c0_i32, %c0_i32_0 : i32, i32, i32
  }
  func.func @transform_1(%arg0: i32) -> (i32, i32) {
    %c0_i32 = arith.constant 0 : i32
    %c0_i32_0 = arith.constant 0 : i32
    %c0_i32_1 = arith.constant 0 : i32
    return %c0_i32, %c0_i32_0 : i32, i32
  }
  func.func @transform_2(%arg0: i32) -> (i32, i32) {
    %c0_i32 = arith.constant 0 : i32
    %c0_i32_0 = arith.constant 0 : i32
    %c0_i32_1 = arith.constant 0 : i32
    return %c0_i32, %c0_i32_0 : i32, i32
  }
  func.func @transform_3(%arg0: i32) -> (i32, i32) {
    %c0_i32 = arith.constant 0 : i32
    %c0_i32_0 = arith.constant 0 : i32
    %c0_i32_1 = arith.constant 0 : i32
    return %c0_i32, %c0_i32_0 : i32, i32
  }
  func.func @transform_4(%arg0: i32) -> (i32, i32) {
    %c0_i32 = arith.constant 0 : i32
    %c0_i32_0 = arith.constant 0 : i32
    %c0_i32_1 = arith.constant 0 : i32
    return %c0_i32, %c0_i32_0 : i32, i32
  }
  func.func @transform_5(%arg0: i32) -> (i32, i32) {
    %c0_i32 = arith.constant 0 : i32
    %c0_i32_0 = arith.constant 0 : i32
    return %arg0, %c0_i32 : i32, i32
  }
}

</mosaic_0001>

<bundles_post_ra>
// kernel: spatial_aware.1
= control target key start
LH: loop header
LB: loop body
LE: loop exit
PB: predicated region body
PF: predicated region fallthrough
CT: control target
= control target key end

     0   :  { %vm22_vm0 = vcmask 125952   ;;  %v279_v0 = vmov 0.0|0.0   ;;  %vm280_vm1 = vmmov 0   ;;  %v281_v3 = vmov 0.0   ;;  %s359_s1 = inlined_call_operand.vmem [shape: f32[16,64], index: 1, kind: input, shape index: {}]   ;;  %s360_s0 = inlined_call_operand.vmem [shape: f32[2,4,16], index: 0, kind: input, shape index: {}]   ;;  %s361_s3 = inlined_call_operand.vmem [shape: f32[64,128], index: 3, kind: input, shape index: {}]   ;;  %s362_s2 = inlined_call_operand.vmem [shape: f32[1,64], index: 2, kind: input, shape index: {}]   ;;  %s363_s4 = inlined_call_operand.vmem [shape: f32[1,128], index: 4, kind: input, shape index: {}]   ;;  %s364_s5 = inlined_call_operand.vmem [shape: f32[2,128], index: 5, kind: output, shape index: {}]  }
   0x1   :  { %261 = vmatprep.subr.bf16.mxu0 %v279_v0  ;;  %v39_v1 = vld [vmem:[%s359_s1] sm:$0xff]  ;;  %v40_v2 = vld [vmem:[%s359_s1 + $0x8] sm:$0xff]  ;;  %239 = vmatprep.mubr.msk.f32.mxu0 %vm280_vm1, %v281_v3  ;;  %v127_v13 = vld [vmem:[%s361_s3 + $0x10] sm:$0xff]  ;;  %vm50_vm2 = vcmask 1041409   ;;  %vm52_vm3 = vcmask 130048   ;;  %vm140_vm4 = vcmask 523264  }
   0x2   :  { %v20_v4 = vld [vmem:[%s360_s0] sm:$0xf]  ;;  %v262_v5 = vpack.c.bf16 %v40_v2, %v39_v1  ;;  %v21_v6 = vld [vmem:[%s360_s0 + $0x4] sm:$0xf]  ;;  %264 = vmatprep.subr.bf16.mxu1 %v279_v0  ;;  %v126_v9 = vld [vmem:[%s361_s3 + $0x8] sm:$0xff]  ;;  %258 = vmatprep.mubr.msk.f32.mxu1 %vm280_vm1, %v281_v3 }
   0x3   :  { %v23_v7 = vsel %vm22_vm0, %v20_v4, 0.0  ;;  %v125_v8 = vld [vmem:[%s361_s3] sm:$0xff]  ;;  %v30_v11 = vsel %vm22_vm0, %v21_v6, 0.0  ;;  %v128_v14 = vld [vmem:[%s361_s3 + $0x18] sm:$0xff]  ;;  %v130_v20 = vld [vmem:[%s361_s3 + $0x28] sm:$0xff] }
   0x4   :  { %v24_v10 = vrot.slane %v23_v7, 4  ;;  %v265_v12 = vpack.c.bf16 %v126_v9, %v125_v8  ;;  %263 = vmatpush3.bf16.msra.mxu0 %v262_v5  ;;  %v31_v15 = vrot.slane %v30_v11, 4  ;;  %v268_v17 = vpack.c.bf16 %v128_v14, %v127_v13  ;;  %v129_v19 = vld [vmem:[%s361_s3 + $0x20] sm:$0xff]  ;;  %v131_v33 = vld [vmem:[%s361_s3 + $0x30] sm:$0xff]  ;;  %v132_v34 = vld [vmem:[%s361_s3 + $0x38] sm:$0xff] }
   0x5   :  { %v271_v24 = vpack.c.bf16 %v130_v20, %v129_v19  ;;  %v274_v35 = vpack.c.bf16 %v132_v34, %v131_v33  ;;  %v219_v36 = vld [vmem:[%s362_s2] ss:$0 sm:$0xff] }
   0x6   :  { %v25_v16 = vadd.f32 %v24_v10, %v23_v7  ;;  %266 = vmatpush3.bf16.msra.mxu1 %v265_v12  ;;  %v32_v18 = vadd.f32 %v31_v15, %v30_v11  ;;  %v221_v40 = vld [vmem:[%s363_s4] ss:$0 sm:$0xff] }
   0x7   :  { %267 = vmatprep.subr.bf16.mxu1 %v279_v0 }
   0x8   :  { %v26_v21 = vrot.slane %v25_v16, 2  ;;  %v33_v22 = vrot.slane %v32_v18, 2 }
   0xa   :  { %v27_v23 = vadd.f32 %v26_v21, %v25_v16  ;;  %269 = vmatpush3.bf16.msra.mxu1 %v268_v17  ;;  %v34_v25 = vadd.f32 %v33_v22, %v32_v18 }
   0xb   :  { %270 = vmatprep.subr.bf16.mxu1 %v279_v0 }
   0xc   :  { %v28_v26 = vrot.slane %v27_v23, 1  ;;  %v35_v27 = vrot.slane %v34_v25, 1 }
   0xe   :  { %v29_v28 = vadd.f32 %v28_v26, %v27_v23  ;;  %272 = vmatpush3.bf16.msra.mxu1 %v271_v24  ;;  %v36_v29 = vadd.f32 %v35_v27, %v34_v25 }
   0xf   :  { %273 = vmatprep.subr.bf16.mxu1 %v279_v0 }
  0x10   :  { %v37_v30 = vmul.f32 0.25, %v29_v28  ;;  %v38_v31 = vmul.f32 0.25, %v36_v29 }
  0x12   :  { %v51_v32 = vsel %vm50_vm2, %v38_v31, %v37_v30  ;;  %275 = vmatpush3.bf16.msra.mxu1 %v274_v35 }
  0x13   :  { %240 = vmatmul.mubr.msk.f32.vlgmr.msra.gmra.mrb[0].mxu0 %vm52_vm3, %v51_v32 }
  0xe6   :  { %v121_v37 = vpop.f32.mrb[0].mxu0 }
  0xe7   :  { %v122_v38 = vadd.f32 %v219_v36, %v121_v37  ;;  %v241_v39 = vpop.f32.mrb[1].mxu0 }
  0xe9   :  { %259 = vmatmul.mubr.msk.f32.vlgmr.msra.gmra.mrb[0].mxu1 %vm140_vm4, %v122_v38 }
 0x1bc   :  { %v210_v41 = vpop.f32.mrb[0].mxu1 }
 0x1bd   :  { %v211_v42 = vadd.f32 %v221_v40, %v210_v41  ;;  %v260_v43 = vpop.f32.mrb[1].mxu1 }
 0x1bf   :  { %214 = vst [vmem:[%s364_s5] sm:$0x3] %v211_v42 }

</bundles_post_ra>
